<compile_context>
chip_gen: v5e
topology: v5e:2x2
jax: 0.10.0
libtpu: 0.0.40
codegen_flags: <defaults>
</compile_context>

<pallas_src>
import functools
import math

import numpy as np
import jax
import jax.numpy as jnp
from jax.experimental import pallas as pl
from jax.experimental.pallas import tpu as pltpu

EPS = 1e-5


# ---------------------------------------------------------------------------
# Kernel
# ---------------------------------------------------------------------------
def _residual_block_kernel(
    xr_ref,   # (N, H + 2*pad, W*Cin_p) f32  input, H-padded, (w, c) on lanes
    w1_ref,   # (K*W*Cin_p, 2*W*Cout)  bf16  conv1 Toeplitz | 1x1 shortcut (centre rows)
    w2_ref,   # (K*W*Cout,  W*Cout)    bf16  conv2 Toeplitz
    p_ref,    # (W*Cout, W*Cout)       f32   0/1 lane->channel collapse+broadcast (S @ S^T)
    vec_ref,  # (9, W*Cout)            f32   tiled [b1,g1,be1, b2,g2,be2, bs,gs,bes]
    out_ref,  # (N*H, W*Cout)          f32   lane-dense output
    h1p_ref,  # VMEM scratch (N, H + 2*pad, W*Cout) f32
    *, K, pad, H, W, Cout,
):
    N = xr_ref.shape[0]
    R = N * H
    WC = W * Cout
    WCin = xr_ref.shape[-1]
    inv_M = 1.0 / (N * H * W)            # BatchNorm population per channel

    P = p_ref[...]
    vec = vec_ref[...]
    ones_r = jnp.ones((1, R), jnp.float32)   # row-sum vector -> MXU reduce

    def windows(ref, lanes):
        # K H-shifted row slabs of an H-padded (N, H+2*pad, lanes) ref,
        # lane-concatenated into the im2col LHS (R, K*lanes) for ONE matmul.
        slabs = [ref[:, kh:kh + H, :].reshape(R, lanes) for kh in range(K)]
        return jnp.concatenate(slabs, axis=-1)

    def batchnorm(y, g, be):
        # Training-mode BN (batch stats, biased var, eps=1e-5). Two-pass
        # (centre first, then E[(x-mean)^2]) so nothing cancels; all
        # reductions / channel collapses run on the MXU:
        #   ones(1,R) @ y  -> per-lane column sums
        #   col @ P        -> per-channel sums broadcast back to all W lanes
        col_s = jnp.dot(ones_r, y, preferred_element_type=jnp.float32)
        mean = jnp.dot(col_s, P, preferred_element_type=jnp.float32) * inv_M
        d = y - mean
        col_v = jnp.dot(ones_r, d * d, preferred_element_type=jnp.float32)
        var = jnp.dot(col_v, P, preferred_element_type=jnp.float32) * inv_M
        return d * jax.lax.rsqrt(var + EPS) * g + be

    # ---- conv1 + fused 1x1 shortcut: one deep-contraction matmul -------------
    lhs1 = windows(xr_ref, WCin).astype(jnp.bfloat16)            # (R, K*WCin)
    yc = jnp.dot(lhs1, w1_ref[...], preferred_element_type=jnp.float32)  # (R, 2*WC)
    y1 = yc[:, :WC] + vec[0:1, :]                                # conv1 + b1
    ysc = yc[:, WC:] + vec[6:7, :]                               # shortcut + bs

    h1 = jnp.maximum(batchnorm(y1, vec[1:2, :], vec[2:3, :]), 0.0)
    sc = batchnorm(ysc, vec[7:8, :], vec[8:9, :])

    # ---- pad h1 along H in a small scratch (1-row borders zeroed once) -------
    if pad > 0:
        h1p_ref[:, :pad, :] = jnp.zeros((N, pad, WC), jnp.float32)
        h1p_ref[:, pad + H:, :] = jnp.zeros((N, pad, WC), jnp.float32)
    h1p_ref[:, pad:pad + H, :] = h1.reshape(N, H, WC)

    # ---- conv2: one matmul; LHS from windowed ref loads (no full reload) -----
    lhs2 = windows(h1p_ref, WC).astype(jnp.bfloat16)             # (R, K*WC)
    y2 = jnp.dot(lhs2, w2_ref[...], preferred_element_type=jnp.float32) + vec[3:4, :]
    out2 = batchnorm(y2, vec[4:5, :], vec[5:6, :])

    # ---- residual add + ReLU, full-128-lane unmasked store -------------------
    out_ref[...] = jnp.maximum(out2 + sc, 0.0).astype(out_ref.dtype)


# ---------------------------------------------------------------------------
# Host-side weight packing (done once per parameter set / spatial width)
# ---------------------------------------------------------------------------
def _row_toeplitz(w_hwio, W, pad):
    """(K, K, Cin, Cout) conv weights -> (K, W*Cin, W*Cout) per-row Toeplitz."""
    K, _, Cin, Cout = w_hwio.shape
    w = np.asarray(w_hwio, np.float32)
    t = np.zeros((K, W * Cin, W * Cout), np.float32)
    for kh in range(K):
        for kw in range(K):
            for wo in range(W):
                wi = wo + kw - pad
                if 0 <= wi < W:
                    t[kh, wi * Cin:(wi + 1) * Cin,
                      wo * Cout:(wo + 1) * Cout] = w[kh, kw]
    return t


def _pointwise_toeplitz(w_io, W):
    """(Cin, Cout) 1x1 conv -> block-diagonal (W*Cin, W*Cout)."""
    Cin, Cout = w_io.shape
    w = np.asarray(w_io, np.float32)
    t = np.zeros((W * Cin, W * Cout), np.float32)
    for wo in range(W):
        t[wo * Cin:(wo + 1) * Cin, wo * Cout:(wo + 1) * Cout] = w
    return t


def pack_params(params, *, H, W, kernel_size=3, padding=1):
    K, pad = kernel_size, padding
    assert K == 2 * pad + 1, "only stride-1 'same' convs are packed"
    Cin = int(params["w1"].shape[2])
    Cout = int(params["w1"].shape[3])
    assert (W * Cout) % 128 == 0, "output lanes must be a 128 multiple"

    # Zero-pad input channels so W*Cin_p is a 128-lane multiple (lane-aligned
    # im2col pieces); padded channels/rows are all-zero, so math is unchanged.
    step = 128 // math.gcd(W, 128)
    Cin_p = int(math.ceil(Cin / step) * step)
    w1 = np.zeros((K, K, Cin_p, Cout), np.float32)
    w1[:, :, :Cin, :] = np.asarray(params["w1"], np.float32)
    ws = np.zeros((Cin_p, Cout), np.float32)
    ws[:Cin, :] = np.asarray(params["ws"], np.float32)

    WCin, WC = W * Cin_p, W * Cout
    t1 = _row_toeplitz(w1, W, pad)                                   # (K, WCin, WC)
    t2 = _row_toeplitz(np.asarray(params["w2"], np.float32), W, pad)  # (K, WC, WC)
    tsc = _pointwise_toeplitz(ws, W)                                 # (WCin, WC)

    # conv1: single (K*WCin, 2*WC) matrix; the 1x1 shortcut columns are
    # nonzero only on the centre-tap row block (it shares the same LHS slab).
    w1pack = np.zeros((K * WCin, 2 * WC), np.float32)
    for kh in range(K):
        w1pack[kh * WCin:(kh + 1) * WCin, :WC] = t1[kh]
    w1pack[pad * WCin:(pad + 1) * WCin, WC:] = tsc
    # conv2: single (K*WC, WC) matrix.
    w2pack = np.concatenate([t2[kh] for kh in range(K)], axis=0)

    # P = S @ S^T: collapses the W lane groups to per-channel sums AND
    # broadcasts them back to every lane in one 0/1 matmul (MXU).
    S = np.tile(np.eye(Cout, dtype=np.float32), (W, 1))             # (WC, Cout)
    P = S @ S.T                                                     # (WC, WC)

    def tiled(name):
        return np.tile(np.asarray(params[name], np.float32).reshape(-1), W)

    vec = np.stack([tiled(k) for k in
                    ("b1", "g1", "be1", "b2", "g2", "be2", "bs", "gs", "bes")])

    return {
        "w1": jnp.asarray(w1pack, jnp.bfloat16),
        "w2": jnp.asarray(w2pack, jnp.bfloat16),
        "P": jnp.asarray(P), "vec": jnp.asarray(vec),
        "Cin": Cin, "Cin_p": Cin_p, "Cout": Cout,
        "W": int(W), "H": int(H), "K": int(K), "pad": int(pad),
    }


# ---------------------------------------------------------------------------
# Wrapper (PyTorch-style NCHW in / NCHW out)
# ---------------------------------------------------------------------------
def residual_block(x_nchw, packed):
    N, Cin, H, W = x_nchw.shape
    K, pad = packed["K"], packed["pad"]
    Cin_p, Cout = packed["Cin_p"], packed["Cout"]
    assert (Cin, H, W) == (packed["Cin"], packed["H"], packed["W"])
    WC = W * Cout

    # NCHW -> (N, H + 2*pad, W*Cin_p): channels interleaved per pixel on the
    # lanes (zero-padded up to Cin_p), padded along H only (W padding is folded
    # into the Toeplitz weights).
    x_nhwc = jnp.transpose(x_nchw, (0, 2, 3, 1))
    if Cin_p > Cin:
        x_nhwc = jnp.pad(x_nhwc, ((0, 0), (0, 0), (0, 0), (0, Cin_p - Cin)))
    xr = x_nhwc.reshape(N, H, W * Cin_p)
    xr = jnp.pad(xr, ((0, 0), (pad, pad), (0, 0)))

    kernel = functools.partial(_residual_block_kernel,
                               K=K, pad=pad, H=H, W=W, Cout=Cout)
    vmem = pl.BlockSpec(memory_space=pltpu.MemorySpace.VMEM)

    # VMEM budget from the actual working set; capped at 32 MiB (v7x
    # default-scoped limit), far under its 64 MiB physical VMEM.
    scratch_bytes = N * (H + 2 * pad) * WC * 4
    operand_bytes = (N * (H + 2 * pad) * W * Cin_p * 4        # xr (f32)
                     + K * W * Cin_p * 2 * WC * 2             # w1pack (bf16)
                     + K * WC * WC * 2                        # w2pack (bf16)
                     + WC * WC * 4 + 9 * WC * 4               # P, vec (f32)
                     + N * H * WC * 4)                        # output (f32)
    vmem_limit = int(max(16 << 20, min(32 << 20, 4 * (operand_bytes + scratch_bytes))))

    out = pl.pallas_call(
        kernel,
        out_shape=jax.ShapeDtypeStruct((N * H, WC), jnp.float32),
        in_specs=[vmem] * 5,
        out_specs=vmem,
        scratch_shapes=[pltpu.VMEM((N, H + 2 * pad, WC), jnp.float32)],
        compiler_params=pltpu.CompilerParams(vmem_limit_bytes=vmem_limit),
    )(xr, packed["w1"], packed["w2"], packed["P"], packed["vec"])

    return jnp.transpose(out.reshape(N, H, W, Cout), (0, 3, 1, 2))


# ---------------------------------------------------------------------------
# Pure-JAX reference (XLA convs, full f32) of the same math, for verification
# ---------------------------------------------------------------------------
def reference_forward(x_nchw, params, *, padding=1):
    x = jnp.transpose(x_nchw, (0, 2, 3, 1))
    dn = ("NHWC", "HWIO", "NHWC")
    prec = jax.lax.Precision.HIGHEST

    def conv(y, w_hwio, b, p):
        out = jax.lax.conv_general_dilated(
            y, w_hwio, (1, 1), [(p, p), (p, p)], dimension_numbers=dn,
            precision=prec)
        return out + b

    def bn(y, g, be):
        mean = jnp.mean(y, axis=(0, 1, 2), keepdims=True)
        var = jnp.mean((y - mean) ** 2, axis=(0, 1, 2), keepdims=True)
        return (y - mean) * jax.lax.rsqrt(var + EPS) * g + be

    h1 = jax.nn.relu(bn(conv(x, params["w1"], params["b1"], padding),
                        params["g1"], params["be1"]))
    out = bn(conv(h1, params["w2"], params["b2"], padding),
             params["g2"], params["be2"])
    ws_hwio = params["ws"][None, None]                 # (1, 1, Cin, Cout)
    sc = bn(conv(x, ws_hwio, params["bs"], 0), params["gs"], params["bes"])
    return jnp.transpose(jax.nn.relu(out + sc), (0, 3, 1, 2))


def make_params(key, cin, cout, k):
    keys = jax.random.split(key, 12)
    n = lambda kk, shape, s=0.1: s * jax.random.normal(kk, shape, jnp.float32)
    return {
        # conv weights stored HWIO: (K, K, Cin, Cout)
        "w1": n(keys[0], (k, k, cin, cout)),
        "b1": n(keys[1], (1, cout)),
        "g1": 1.0 + n(keys[2], (1, cout)),
        "be1": n(keys[3], (1, cout)),
        "w2": n(keys[4], (k, k, cout, cout)),
        "b2": n(keys[5], (1, cout)),
        "g2": 1.0 + n(keys[6], (1, cout)),
        "be2": n(keys[7], (1, cout)),
        "ws": n(keys[8], (cin, cout)),                 # 1x1 shortcut conv
        "bs": n(keys[9], (1, cout)),
        "gs": 1.0 + n(keys[10], (1, cout)),
        "bes": n(keys[11], (1, cout)),
    }


if __name__ == "__main__":
    N, Cin, Cout, H, W, K, PAD = 2, 4, 8, 16, 16, 3, 1
    key = jax.random.PRNGKey(0)
    kx, kp = jax.random.split(key)
    x = jax.random.normal(kx, (N, Cin, H, W), jnp.float32)
    params = make_params(kp, Cin, Cout, K)
    packed = pack_params(params, H=H, W=W, kernel_size=K, padding=PAD)

    out = jax.block_until_ready(residual_block(x, packed))
    ref = jax.block_until_ready(reference_forward(x, params, padding=PAD))

    assert out.shape == (N, Cout, H, W)
    max_err = float(jnp.max(jnp.abs(out - ref)))
    # tolerance covers the deliberate bf16 MXU operand path (matches the MXU's
    # default f32-precision behaviour) vs the HIGHEST-precision f32 reference;
    # any packing/layout bug would produce O(1) errors.
    assert max_err < 2e-2, f"mismatch vs reference: max abs err {max_err}"

    print("KERNEL_OK")
</pallas_src>

<mosaic_0001>
module attributes {stable_mosaic.version = 11 : i64} {
  func.func @_residual_block_kernel(%arg0: memref<2x18x128xf32, #tpu.memory_space<vmem>>, %arg1: memref<384x256xbf16, #tpu.memory_space<vmem>>, %arg2: memref<384x128xbf16, #tpu.memory_space<vmem>>, %arg3: memref<128x128xf32, #tpu.memory_space<vmem>>, %arg4: memref<9x128xf32, #tpu.memory_space<vmem>>, %arg5: memref<32x128xf32, #tpu.memory_space<vmem>>, %arg6: memref<2x18x128xf32, #tpu.memory_space<vmem>>) attributes {dimension_semantics = [], scalar_prefetch = 0 : i64, scratch_operands = 1 : i64, tpu.core_type = #tpu.core_type<tc>} {
    %c0 = arith.constant 0 : index
    %c0_0 = arith.constant 0 : index
    %0 = vector.load %arg3[%c0, %c0_0] : memref<128x128xf32, #tpu.memory_space<vmem>>, vector<128x128xf32>
    %c0_1 = arith.constant 0 : index
    %c0_2 = arith.constant 0 : index
    %1 = vector.load %arg4[%c0_1, %c0_2] : memref<9x128xf32, #tpu.memory_space<vmem>>, vector<9x128xf32>
    %cst = arith.constant 1.000000e+00 : f32
    %2 = vector.broadcast %cst : f32 to vector<1x32xf32>
    %c0_3 = arith.constant 0 : index
    %c0_4 = arith.constant 0 : index
    %c0_5 = arith.constant 0 : index
    %3 = vector.load %arg0[%c0_3, %c0_4, %c0_5] : memref<2x18x128xf32, #tpu.memory_space<vmem>>, vector<2x16x128xf32>
    %4 = vector.shape_cast %3 : vector<2x16x128xf32> to vector<32x128xf32>
    %c0_6 = arith.constant 0 : index
    %c1 = arith.constant 1 : index
    %c0_7 = arith.constant 0 : index
    %5 = vector.load %arg0[%c0_6, %c1, %c0_7] : memref<2x18x128xf32, #tpu.memory_space<vmem>>, vector<2x16x128xf32>
    %6 = vector.shape_cast %5 : vector<2x16x128xf32> to vector<32x128xf32>
    %c0_8 = arith.constant 0 : index
    %c2 = arith.constant 2 : index
    %c0_9 = arith.constant 0 : index
    %7 = vector.load %arg0[%c0_8, %c2, %c0_9] : memref<2x18x128xf32, #tpu.memory_space<vmem>>, vector<2x16x128xf32>
    %8 = vector.shape_cast %7 : vector<2x16x128xf32> to vector<32x128xf32>
    %9 = tpu.concatenate %4, %6, %8 in 1 : vector<32x128xf32>, vector<32x128xf32>, vector<32x128xf32> -> vector<32x384xf32>
    %10 = arith.truncf %9 : vector<32x384xf32> to vector<32x384xbf16>
    %c0_10 = arith.constant 0 : index
    %c0_11 = arith.constant 0 : index
    %11 = vector.load %arg1[%c0_10, %c0_11] : memref<384x256xbf16, #tpu.memory_space<vmem>>, vector<384x256xbf16>
    %cst_12 = arith.constant dense<0.000000e+00> : vector<32x256xf32>
    %12 = tpu.matmul %10, %11, %cst_12 {dimension_numbers = #tpu.dot_dimension_numbers<[1], [0], [0], [1], [0, 0, 1, 1], [], []>} : vector<32x384xbf16>, vector<384x256xbf16>, vector<32x256xf32> -> vector<32x256xf32>
    %13 = vector.extract_strided_slice %12 {offsets = [0, 0], sizes = [32, 128], strides = [1, 1]} : vector<32x256xf32> to vector<32x128xf32>
    %14 = vector.extract_strided_slice %1 {offsets = [0, 0], sizes = [1, 128], strides = [1, 1]} : vector<9x128xf32> to vector<1x128xf32>
    %15 = vector.broadcast %14 : vector<1x128xf32> to vector<32x128xf32>
    %16 = arith.addf %13, %15 : vector<32x128xf32>
    %17 = vector.extract_strided_slice %12 {offsets = [0, 128], sizes = [32, 128], strides = [1, 1]} : vector<32x256xf32> to vector<32x128xf32>
    %18 = vector.extract_strided_slice %1 {offsets = [6, 0], sizes = [1, 128], strides = [1, 1]} : vector<9x128xf32> to vector<1x128xf32>
    %19 = vector.broadcast %18 : vector<1x128xf32> to vector<32x128xf32>
    %20 = arith.addf %17, %19 : vector<32x128xf32>
    %21 = vector.extract_strided_slice %1 {offsets = [1, 0], sizes = [1, 128], strides = [1, 1]} : vector<9x128xf32> to vector<1x128xf32>
    %22 = vector.extract_strided_slice %1 {offsets = [2, 0], sizes = [1, 128], strides = [1, 1]} : vector<9x128xf32> to vector<1x128xf32>
    %cst_13 = arith.constant dense<0.000000e+00> : vector<1x128xf32>
    %23 = tpu.matmul %2, %16, %cst_13 {dimension_numbers = #tpu.dot_dimension_numbers<[1], [0], [0], [1], [0, 0, 1, 1], [], []>} : vector<1x32xf32>, vector<32x128xf32>, vector<1x128xf32> -> vector<1x128xf32>
    %cst_14 = arith.constant dense<0.000000e+00> : vector<1x128xf32>
    %24 = tpu.matmul %23, %0, %cst_14 {dimension_numbers = #tpu.dot_dimension_numbers<[1], [0], [0], [1], [0, 0, 1, 1], [], []>} : vector<1x128xf32>, vector<128x128xf32>, vector<1x128xf32> -> vector<1x128xf32>
    %cst_15 = arith.constant 0.001953125 : f32
    %25 = vector.broadcast %cst_15 : f32 to vector<1x128xf32>
    %26 = arith.mulf %24, %25 : vector<1x128xf32>
    %27 = vector.broadcast %26 : vector<1x128xf32> to vector<32x128xf32>
    %28 = arith.subf %16, %27 : vector<32x128xf32>
    %29 = arith.mulf %28, %28 : vector<32x128xf32>
    %cst_16 = arith.constant dense<0.000000e+00> : vector<1x128xf32>
    %30 = tpu.matmul %2, %29, %cst_16 {dimension_numbers = #tpu.dot_dimension_numbers<[1], [0], [0], [1], [0, 0, 1, 1], [], []>} : vector<1x32xf32>, vector<32x128xf32>, vector<1x128xf32> -> vector<1x128xf32>
    %cst_17 = arith.constant dense<0.000000e+00> : vector<1x128xf32>
    %31 = tpu.matmul %30, %0, %cst_17 {dimension_numbers = #tpu.dot_dimension_numbers<[1], [0], [0], [1], [0, 0, 1, 1], [], []>} : vector<1x128xf32>, vector<128x128xf32>, vector<1x128xf32> -> vector<1x128xf32>
    %cst_18 = arith.constant 0.001953125 : f32
    %32 = vector.broadcast %cst_18 : f32 to vector<1x128xf32>
    %33 = arith.mulf %31, %32 : vector<1x128xf32>
    %cst_19 = arith.constant 9.99999974E-6 : f32
    %34 = vector.broadcast %cst_19 : f32 to vector<1x128xf32>
    %35 = arith.addf %33, %34 : vector<1x128xf32>
    %36 = math.rsqrt %35 : vector<1x128xf32>
    %37 = vector.broadcast %36 : vector<1x128xf32> to vector<32x128xf32>
    %38 = arith.mulf %28, %37 : vector<32x128xf32>
    %39 = vector.broadcast %21 : vector<1x128xf32> to vector<32x128xf32>
    %40 = arith.mulf %38, %39 : vector<32x128xf32>
    %41 = vector.broadcast %22 : vector<1x128xf32> to vector<32x128xf32>
    %42 = arith.addf %40, %41 : vector<32x128xf32>
    %cst_20 = arith.constant 0.000000e+00 : f32
    %43 = vector.broadcast %cst_20 : f32 to vector<32x128xf32>
    %44 = arith.maximumf %42, %43 : vector<32x128xf32>
    %45 = vector.extract_strided_slice %1 {offsets = [7, 0], sizes = [1, 128], strides = [1, 1]} : vector<9x128xf32> to vector<1x128xf32>
    %46 = vector.extract_strided_slice %1 {offsets = [8, 0], sizes = [1, 128], strides = [1, 1]} : vector<9x128xf32> to vector<1x128xf32>
    %cst_21 = arith.constant dense<0.000000e+00> : vector<1x128xf32>
    %47 = tpu.matmul %2, %20, %cst_21 {dimension_numbers = #tpu.dot_dimension_numbers<[1], [0], [0], [1], [0, 0, 1, 1], [], []>} : vector<1x32xf32>, vector<32x128xf32>, vector<1x128xf32> -> vector<1x128xf32>
    %cst_22 = arith.constant dense<0.000000e+00> : vector<1x128xf32>
    %48 = tpu.matmul %47, %0, %cst_22 {dimension_numbers = #tpu.dot_dimension_numbers<[1], [0], [0], [1], [0, 0, 1, 1], [], []>} : vector<1x128xf32>, vector<128x128xf32>, vector<1x128xf32> -> vector<1x128xf32>
    %cst_23 = arith.constant 0.001953125 : f32
    %49 = vector.broadcast %cst_23 : f32 to vector<1x128xf32>
    %50 = arith.mulf %48, %49 : vector<1x128xf32>
    %51 = vector.broadcast %50 : vector<1x128xf32> to vector<32x128xf32>
    %52 = arith.subf %20, %51 : vector<32x128xf32>
    %53 = arith.mulf %52, %52 : vector<32x128xf32>
    %cst_24 = arith.constant dense<0.000000e+00> : vector<1x128xf32>
    %54 = tpu.matmul %2, %53, %cst_24 {dimension_numbers = #tpu.dot_dimension_numbers<[1], [0], [0], [1], [0, 0, 1, 1], [], []>} : vector<1x32xf32>, vector<32x128xf32>, vector<1x128xf32> -> vector<1x128xf32>
    %cst_25 = arith.constant dense<0.000000e+00> : vector<1x128xf32>
    %55 = tpu.matmul %54, %0, %cst_25 {dimension_numbers = #tpu.dot_dimension_numbers<[1], [0], [0], [1], [0, 0, 1, 1], [], []>} : vector<1x128xf32>, vector<128x128xf32>, vector<1x128xf32> -> vector<1x128xf32>
    %cst_26 = arith.constant 0.001953125 : f32
    %56 = vector.broadcast %cst_26 : f32 to vector<1x128xf32>
    %57 = arith.mulf %55, %56 : vector<1x128xf32>
    %cst_27 = arith.constant 9.99999974E-6 : f32
    %58 = vector.broadcast %cst_27 : f32 to vector<1x128xf32>
    %59 = arith.addf %57, %58 : vector<1x128xf32>
    %60 = math.rsqrt %59 : vector<1x128xf32>
    %61 = vector.broadcast %60 : vector<1x128xf32> to vector<32x128xf32>
    %62 = arith.mulf %52, %61 : vector<32x128xf32>
    %63 = vector.broadcast %45 : vector<1x128xf32> to vector<32x128xf32>
    %64 = arith.mulf %62, %63 : vector<32x128xf32>
    %65 = vector.broadcast %46 : vector<1x128xf32> to vector<32x128xf32>
    %66 = arith.addf %64, %65 : vector<32x128xf32>
    %cst_28 = arith.constant 0.000000e+00 : f32
    %67 = vector.broadcast %cst_28 : f32 to vector<2x1x128xf32>
    %c0_29 = arith.constant 0 : index
    %c0_30 = arith.constant 0 : index
    %c0_31 = arith.constant 0 : index
    %68 = vector.load %arg6[%c0_29, %c0_30, %c0_31] : memref<2x18x128xf32, #tpu.memory_space<vmem>>, vector<2x1x128xf32>
    tpu.vector_store %arg6[%c0_29, %c0_30, %c0_31], %67 {strides = array<i32>} : memref<2x18x128xf32, #tpu.memory_space<vmem>>, vector<2x1x128xf32>,
    %cst_32 = arith.constant 0.000000e+00 : f32
    %69 = vector.broadcast %cst_32 : f32 to vector<2x1x128xf32>
    %c0_33 = arith.constant 0 : index
    %c17 = arith.constant 17 : index
    %c0_34 = arith.constant 0 : index
    %70 = vector.load %arg6[%c0_33, %c17, %c0_34] : memref<2x18x128xf32, #tpu.memory_space<vmem>>, vector<2x1x128xf32>
    tpu.vector_store %arg6[%c0_33, %c17, %c0_34], %69 {strides = array<i32>} : memref<2x18x128xf32, #tpu.memory_space<vmem>>, vector<2x1x128xf32>,
    %71 = vector.shape_cast %44 : vector<32x128xf32> to vector<2x16x128xf32>
    %c0_35 = arith.constant 0 : index
    %c1_36 = arith.constant 1 : index
    %c0_37 = arith.constant 0 : index
    %72 = vector.load %arg6[%c0_35, %c1_36, %c0_37] : memref<2x18x128xf32, #tpu.memory_space<vmem>>, vector<2x16x128xf32>
    tpu.vector_store %arg6[%c0_35, %c1_36, %c0_37], %71 {strides = array<i32>} : memref<2x18x128xf32, #tpu.memory_space<vmem>>, vector<2x16x128xf32>,
    %c0_38 = arith.constant 0 : index
    %c0_39 = arith.constant 0 : index
    %c0_40 = arith.constant 0 : index
    %73 = vector.load %arg6[%c0_38, %c0_39, %c0_40] : memref<2x18x128xf32, #tpu.memory_space<vmem>>, vector<2x16x128xf32>
    %74 = vector.shape_cast %73 : vector<2x16x128xf32> to vector<32x128xf32>
    %c0_41 = arith.constant 0 : index
    %c1_42 = arith.constant 1 : index
    %c0_43 = arith.constant 0 : index
    %75 = vector.load %arg6[%c0_41, %c1_42, %c0_43] : memref<2x18x128xf32, #tpu.memory_space<vmem>>, vector<2x16x128xf32>
    %76 = vector.shape_cast %75 : vector<2x16x128xf32> to vector<32x128xf32>
    %c0_44 = arith.constant 0 : index
    %c2_45 = arith.constant 2 : index
    %c0_46 = arith.constant 0 : index
    %77 = vector.load %arg6[%c0_44, %c2_45, %c0_46] : memref<2x18x128xf32, #tpu.memory_space<vmem>>, vector<2x16x128xf32>
    %78 = vector.shape_cast %77 : vector<2x16x128xf32> to vector<32x128xf32>
    %79 = tpu.concatenate %74, %76, %78 in 1 : vector<32x128xf32>, vector<32x128xf32>, vector<32x128xf32> -> vector<32x384xf32>
    %80 = arith.truncf %79 : vector<32x384xf32> to vector<32x384xbf16>
    %c0_47 = arith.constant 0 : index
    %c0_48 = arith.constant 0 : index
    %81 = vector.load %arg2[%c0_47, %c0_48] : memref<384x128xbf16, #tpu.memory_space<vmem>>, vector<384x128xbf16>
    %cst_49 = arith.constant dense<0.000000e+00> : vector<32x128xf32>
    %82 = tpu.matmul %80, %81, %cst_49 {dimension_numbers = #tpu.dot_dimension_numbers<[1], [0], [0], [1], [0, 0, 1, 1], [], []>} : vector<32x384xbf16>, vector<384x128xbf16>, vector<32x128xf32> -> vector<32x128xf32>
    %83 = vector.extract_strided_slice %1 {offsets = [3, 0], sizes = [1, 128], strides = [1, 1]} : vector<9x128xf32> to vector<1x128xf32>
    %84 = vector.broadcast %83 : vector<1x128xf32> to vector<32x128xf32>
    %85 = arith.addf %82, %84 : vector<32x128xf32>
    %86 = vector.extract_strided_slice %1 {offsets = [4, 0], sizes = [1, 128], strides = [1, 1]} : vector<9x128xf32> to vector<1x128xf32>
    %87 = vector.extract_strided_slice %1 {offsets = [5, 0], sizes = [1, 128], strides = [1, 1]} : vector<9x128xf32> to vector<1x128xf32>
    %cst_50 = arith.constant dense<0.000000e+00> : vector<1x128xf32>
    %88 = tpu.matmul %2, %85, %cst_50 {dimension_numbers = #tpu.dot_dimension_numbers<[1], [0], [0], [1], [0, 0, 1, 1], [], []>} : vector<1x32xf32>, vector<32x128xf32>, vector<1x128xf32> -> vector<1x128xf32>
    %cst_51 = arith.constant dense<0.000000e+00> : vector<1x128xf32>
    %89 = tpu.matmul %88, %0, %cst_51 {dimension_numbers = #tpu.dot_dimension_numbers<[1], [0], [0], [1], [0, 0, 1, 1], [], []>} : vector<1x128xf32>, vector<128x128xf32>, vector<1x128xf32> -> vector<1x128xf32>
    %cst_52 = arith.constant 0.001953125 : f32
    %90 = vector.broadcast %cst_52 : f32 to vector<1x128xf32>
    %91 = arith.mulf %89, %90 : vector<1x128xf32>
    %92 = vector.broadcast %91 : vector<1x128xf32> to vector<32x128xf32>
    %93 = arith.subf %85, %92 : vector<32x128xf32>
    %94 = arith.mulf %93, %93 : vector<32x128xf32>
    %cst_53 = arith.constant dense<0.000000e+00> : vector<1x128xf32>
    %95 = tpu.matmul %2, %94, %cst_53 {dimension_numbers = #tpu.dot_dimension_numbers<[1], [0], [0], [1], [0, 0, 1, 1], [], []>} : vector<1x32xf32>, vector<32x128xf32>, vector<1x128xf32> -> vector<1x128xf32>
    %cst_54 = arith.constant dense<0.000000e+00> : vector<1x128xf32>
    %96 = tpu.matmul %95, %0, %cst_54 {dimension_numbers = #tpu.dot_dimension_numbers<[1], [0], [0], [1], [0, 0, 1, 1], [], []>} : vector<1x128xf32>, vector<128x128xf32>, vector<1x128xf32> -> vector<1x128xf32>
    %cst_55 = arith.constant 0.001953125 : f32
    %97 = vector.broadcast %cst_55 : f32 to vector<1x128xf32>
    %98 = arith.mulf %96, %97 : vector<1x128xf32>
    %cst_56 = arith.constant 9.99999974E-6 : f32
    %99 = vector.broadcast %cst_56 : f32 to vector<1x128xf32>
    %100 = arith.addf %98, %99 : vector<1x128xf32>
    %101 = math.rsqrt %100 : vector<1x128xf32>
    %102 = vector.broadcast %101 : vector<1x128xf32> to vector<32x128xf32>
    %103 = arith.mulf %93, %102 : vector<32x128xf32>
    %104 = vector.broadcast %86 : vector<1x128xf32> to vector<32x128xf32>
    %105 = arith.mulf %103, %104 : vector<32x128xf32>
    %106 = vector.broadcast %87 : vector<1x128xf32> to vector<32x128xf32>
    %107 = arith.addf %105, %106 : vector<32x128xf32>
    %108 = arith.addf %107, %66 : vector<32x128xf32>
    %cst_57 = arith.constant 0.000000e+00 : f32
    %109 = vector.broadcast %cst_57 : f32 to vector<32x128xf32>
    %110 = arith.maximumf %108, %109 : vector<32x128xf32>
    %c0_58 = arith.constant 0 : index
    %c0_59 = arith.constant 0 : index
    %111 = vector.load %arg5[%c0_58, %c0_59] : memref<32x128xf32, #tpu.memory_space<vmem>>, vector<32x128xf32>
    tpu.vector_store %arg5[%c0_58, %c0_59], %110 {strides = array<i32>} : memref<32x128xf32, #tpu.memory_space<vmem>>, vector<32x128xf32>,
    return
  }
}

</mosaic_0001>

<bundles_post_ra>
// kernel: tpu_custom_call.1
= control target key start
LH: loop header
LB: loop body
LE: loop exit
PB: predicated region body
PF: predicated region fallthrough
CT: control target
= control target key end

     0   :  { %10 = vsyncpa [#allocation4], 0  ;;  %s2013_s0 = inlined_call_operand.vmem [shape: f32[2,18,128], index: 0, kind: input, shape index: {}]   ;;  %s2014_s1 = inlined_call_operand.hbm [shape: bf16[384,256], index: 1, kind: input, shape index: {}]   ;;  %s2015_s2 = inlined_call_operand.hbm [shape: bf16[384,128], index: 2, kind: input, shape index: {}]   ;;  %s2016_s3 = inlined_call_operand.hbm [shape: f32[128,128], index: 3, kind: input, shape index: {}]   ;;  %s2017_s4 = inlined_call_operand.vmem [shape: f32[9,128], index: 4, kind: input, shape index: {}]   ;;  %s2018_s5 = inlined_call_operand.hbm [shape: f32[32,128], index: 5, kind: output, shape index: {}]  }
   0x1   :  { %11 = vsyncpa [#allocation7], 0  ;;  %s32_s20 = sshll.u32 %s2015_s2, 4  ;;  %s33_s20 = int_to_ptr.hbm [resolvable:$true] %s32_s20 }
   0x2   :  { %12 = vsyncpa [#allocation5], 0  ;;  %s1668_s21 = smov [#allocation6]   ;;  %s19_s25 = sshll.u32 %s2014_s1, 4  ;;  %s20_s25 = int_to_ptr.hbm [resolvable:$true] %s19_s25 }
   0x3   :  { %s34_s22 = sshll.u32 %s1668_s21, 4  ;;  %s1669_s26 = smov 64   ;;  %s35_s22 = int_to_ptr.vmem [resolvable:$true] %s34_s22 }
   0x4   :  { %s1670_s27 = smov 4   ;;  %s1671_s28 = smov [#allocation3]  }
   0x5   :  { %40 = dma.hbm_to_vmem [thread:$0]  %s33_s20, 3072, %s35_s22, [#allocation7], %s1669_s26, %s1669_s26, %s1670_s27  }
   0x6   :  { %s21_s29 = sshll.u32 %s1671_s28, 4  ;;  %s1672_s30 = smov 128   ;;  %s22_s29 = int_to_ptr.vmem [resolvable:$true] %s21_s29 }
   0x7   :  { %s1673_s6 = smov 8   ;;  %s45_s8 = sshll.u32 %s2016_s3, 4  ;;  %s46_s8 = int_to_ptr.hbm [resolvable:$true] %s45_s8 }
   0x8   :  { %27 = dma.hbm_to_vmem [thread:$0]  %s20_s25, 6144, %s22_s29, [#allocation4], %s1672_s30, %s1672_s30, %s1673_s6  }
   0x9   :  { %s1674_s9 = smov [#allocation8]  }
   0xa   :  { %s47_s1 = sshll.u32 %s1674_s9, 4  ;;  %s48_s1 = int_to_ptr.vmem [resolvable:$true] %s47_s1 }
   0xb   :  { %53 = dma.hbm_to_vmem [thread:$0]  %s46_s8, 2048, %s48_s1, [#allocation7], %s1672_s30, %s1672_s30, %s1673_s6  }
   0xc   :  { %1662 = dma.done.wait [#allocation4], 6144  }
   0xd   :  { %1663 = vsyncadd [#allocation4], 4294961152 }
   0xe   :  { %1664 = dma.done.wait [#allocation7], 5120  }
   0xf   :  { %1665 = vsyncadd [#allocation7], 4294962176  ;;  %v1241_v0 = vld [vmem:[#allocation3 + $0x70] sm:$0xf]  ;;  %v1492_v1 = vld [vmem:[#allocation3 + $0x74] sm:$0xf0] }
  0x10   :  { %v1305_v2 = vld [vmem:[#allocation3 + $0xf0] sm:$0xf]  ;;  %v1242_v3 = vor.u32 %v1492_v1, %v1241_v0  ;;  %v1508_v4 = vld [vmem:[#allocation3 + $0xf4] sm:$0xf0]  ;;  %v1233_v9 = vld [vmem:[#allocation3 + $0x60] sm:$0xf] }
  0x11   :  { %v1369_v5 = vld [vmem:[#allocation3 + $0x170] sm:$0xf]  ;;  %v1524_v6 = vld [vmem:[#allocation3 + $0x174] sm:$0xf0]  ;;  %v1306_v7 = vor.u32 %v1508_v4, %v1305_v2  ;;  %v1490_v10 = vld [vmem:[#allocation3 + $0x64] sm:$0xf0] }
  0x12   :  { %v1370_v8 = vor.u32 %v1524_v6, %v1369_v5  ;;  %v1297_v11 = vld [vmem:[#allocation3 + $0xe0] sm:$0xf]  ;;  %392 = vmatpush.bf16.msra.mxu0 %v1242_v3  ;;  %v1234_v12 = vor.u32 %v1490_v10, %v1233_v9  ;;  %v1506_v13 = vld [vmem:[#allocation3 + $0xe4] sm:$0xf0]  ;;  %v1225_v18 = vld [vmem:[#allocation3 + $0x50] sm:$0xf] }
  0x13   :  { %v1361_v14 = vld [vmem:[#allocation3 + $0x160] sm:$0xf]  ;;  %v1522_v15 = vld [vmem:[#allocation3 + $0x164] sm:$0xf0]  ;;  %411 = vmatpush.bf16.msra.mxu1 %v1306_v7  ;;  %v1298_v16 = vor.u32 %v1506_v13, %v1297_v11  ;;  %v1488_v19 = vld [vmem:[#allocation3 + $0x54] sm:$0xf0] }
  0x14   :  { %430 = vmatpush.bf16.msra.mxu2 %v1370_v8  ;;  %v1362_v17 = vor.u32 %v1522_v15, %v1361_v14  ;;  %v1289_v20 = vld [vmem:[#allocation3 + $0xd0] sm:$0xf]  ;;  %v1504_v21 = vld [vmem:[#allocation3 + $0xd4] sm:$0xf0]  ;;  %v1226_v24 = vor.u32 %v1488_v19, %v1225_v18  ;;  %v1217_v27 = vld [vmem:[#allocation3 + $0x40] sm:$0xf] }
  0x15   :  { %v1353_v22 = vld [vmem:[#allocation3 + $0x150] sm:$0xf]  ;;  %v1520_v23 = vld [vmem:[#allocation3 + $0x154] sm:$0xf0]  ;;  %v1290_v25 = vor.u32 %v1504_v21, %v1289_v20  ;;  %v1486_v28 = vld [vmem:[#allocation3 + $0x44] sm:$0xf0] }
  0x16   :  { %393 = vmatpush.bf16.msra.mxu0 %v1234_v12  ;;  %v1354_v26 = vor.u32 %v1520_v23, %v1353_v22  ;;  %v1281_v29 = vld [vmem:[#allocation3 + $0xc0] sm:$0xf]  ;;  %v1502_v30 = vld [vmem:[#allocation3 + $0xc4] sm:$0xf0]  ;;  %v1218_v33 = vor.u32 %v1486_v28, %v1217_v27  ;;  %v1209_v36 = vld [vmem:[#allocation3 + $0x30] sm:$0xf] }
  0x17   :  { %412 = vmatpush.bf16.msra.mxu1 %v1298_v16  ;;  %v1345_v31 = vld [vmem:[#allocation3 + $0x140] sm:$0xf]  ;;  %v1518_v32 = vld [vmem:[#allocation3 + $0x144] sm:$0xf0]  ;;  %v1282_v34 = vor.u32 %v1502_v30, %v1281_v29  ;;  %v1484_v37 = vld [vmem:[#allocation3 + $0x34] sm:$0xf0] }
  0x18   :  { %431 = vmatpush.bf16.msra.mxu2 %v1362_v17  ;;  %v1346_v35 = vor.u32 %v1518_v32, %v1345_v31  ;;  %v1273_v38 = vld [vmem:[#allocation3 + $0xb0] sm:$0xf]  ;;  %v1500_v39 = vld [vmem:[#allocation3 + $0xb4] sm:$0xf0]  ;;  %v1210_v42 = vor.u32 %v1484_v37, %v1209_v36  ;;  %v1201_v45 = vld [vmem:[#allocation3 + $0x20] sm:$0xf] }
  0x19   :  { %v1337_v40 = vld [vmem:[#allocation3 + $0x130] sm:$0xf]  ;;  %v1516_v41 = vld [vmem:[#allocation3 + $0x134] sm:$0xf0]  ;;  %v1274_v43 = vor.u32 %v1500_v39, %v1273_v38  ;;  %v1482_v46 = vld [vmem:[#allocation3 + $0x24] sm:$0xf0] }
  0x1a   :  { %394 = vmatpush.bf16.msra.mxu0 %v1226_v24  ;;  %v1338_v44 = vor.u32 %v1516_v41, %v1337_v40  ;;  %v1265_v47 = vld [vmem:[#allocation3 + $0xa0] sm:$0xf]  ;;  %v1498_v48 = vld [vmem:[#allocation3 + $0xa4] sm:$0xf0]  ;;  %v1193_v51 = vld [vmem:[#allocation3 + $0x10] sm:$0xf]  ;;  %v1202_v52 = vor.u32 %v1482_v46, %v1201_v45 }
  0x1b   :  { %413 = vmatpush.bf16.msra.mxu1 %v1290_v25  ;;  %v1329_v49 = vld [vmem:[#allocation3 + $0x120] sm:$0xf]  ;;  %v1514_v50 = vld [vmem:[#allocation3 + $0x124] sm:$0xf0]  ;;  %v1480_v53 = vld [vmem:[#allocation3 + $0x14] sm:$0xf0]  ;;  %v1266_v56 = vor.u32 %v1498_v48, %v1265_v47 }
  0x1c   :  { %432 = vmatpush.bf16.msra.mxu2 %v1354_v26  ;;  %v1257_v54 = vld [vmem:[#allocation3 + $0x90] sm:$0xf]  ;;  %v1496_v55 = vld [vmem:[#allocation3 + $0x94] sm:$0xf0]  ;;  %v1330_v57 = vor.u32 %v1514_v50, %v1329_v49  ;;  %v1491_v58 = vld [vmem:[#allocation3 + $0x74] sm:$0xf]  ;;  %v1194_v2 = vor.u32 %v1480_v53, %v1193_v51 }
  0x1d   :  { %v1243_v59 = vld [vmem:[#allocation3 + $0x78] sm:$0xf0]  ;;  %v1489_v60 = vld [vmem:[#allocation3 + $0x64] sm:$0xf]  ;;  %v1321_v61 = vld [vmem:[#allocation3 + $0x110] sm:$0xf]  ;;  %v1258_v7 = vor.u32 %v1496_v55, %v1257_v54 }
  0x1e   :  { %395 = vmatpush.bf16.msra.mxu0 %v1218_v33  ;;  %v1512_v62 = vld [vmem:[#allocation3 + $0x114] sm:$0xf0]  ;;  %v1246_v63 = vor.u32 %v1491_v58, %v1243_v59  ;;  %v1235_v0 = vld [vmem:[#allocation3 + $0x68] sm:$0xf0]  ;;  %v1185_v1 = vld [vmem:[#allocation3] sm:$0xf] }
  0x1f   :  { %414 = vmatpush.bf16.msra.mxu1 %v1282_v34  ;;  %v1478_v3 = vld [vmem:[#allocation3 + $0x4] sm:$0xf0]  ;;  %v1249_v4 = vld [vmem:[#allocation3 + $0x80] sm:$0xf]  ;;  %v1238_v6 = vor.u32 %v1489_v60, %v1235_v0  ;;  %v1322_v8 = vor.u32 %v1512_v62, %v1321_v61  ;;  %v1487_v10 = vld [vmem:[#allocation3 + $0x54] sm:$0xf] }
  0x20   :  { %433 = vmatpush.bf16.msra.mxu2 %v1346_v35  ;;  %v1494_v5 = vld [vmem:[#allocation3 + $0x84] sm:$0xf0]  ;;  %449 = vmatpush.bf16.msra.mxu3 %v1246_v63  ;;  %v1313_v9 = vld [vmem:[#allocation3 + $0x100] sm:$0xf]  ;;  %v1227_v11 = vld [vmem:[#allocation3 + $0x58] sm:$0xf0]  ;;  %v1186_v18 = vor.u32 %v1478_v3, %v1185_v1 }
  0x21   :  { %v1510_v12 = vld [vmem:[#allocation3 + $0x104] sm:$0xf0]  ;;  %v86_v13 = vld [vmem:[%s2013_s0] sm:$0xff]  ;;  %v1307_v15 = vld [vmem:[#allocation3 + $0xf8] sm:$0xf0]  ;;  %v1230_v21 = vor.u32 %v1487_v10, %v1227_v11  ;;  %v1250_v22 = vor.u32 %v1494_v5, %v1249_v4  ;;  %vm516_vm0 = vcmask 261120  }
  0x22   :  { %396 = vmatpush.bf16.msra.mxu0 %v1210_v42  ;;  %v1507_v14 = vld [vmem:[#allocation3 + $0xf4] sm:$0xf]  ;;  %v1371_v17 = vld [vmem:[#allocation3 + $0x178] sm:$0xf0]  ;;  %v1314_v23 = vor.u32 %v1510_v12, %v1313_v9  ;;  %v1505_v29 = vld [vmem:[#allocation3 + $0xe4] sm:$0xf] }
  0x23   :  { %415 = vmatpush.bf16.msra.mxu1 %v1274_v43  ;;  %v1523_v16 = vld [vmem:[#allocation3 + $0x174] sm:$0xf]  ;;  %v87_v19 = vld [vmem:[%s2013_s0 + $0x8] sm:$0xff]  ;;  %v1310_v27 = vor.u32 %v1507_v14, %v1307_v15  ;;  %v1485_v30 = vld [vmem:[#allocation3 + $0x44] sm:$0xf]  ;;  %s1169_s13 = sshll.u32 %s2018_s5, 4  ;;  %s1170_s13 = int_to_ptr.hbm [resolvable:$true] %s1169_s13 }
  0x24   :  { %434 = vmatpush.bf16.msra.mxu2 %v1338_v44  ;;  %v90_v20 = vld [vmem:[%s2013_s0 + $0x1] sm:$0xff]  ;;  %450 = vmatpush.bf16.msra.mxu3 %v1238_v6  ;;  %v91_v24 = vld [vmem:[%s2013_s0 + $0x9] sm:$0xff]  ;;  %v1374_v28 = vor.u32 %v1523_v16, %v1371_v17  ;;  %v1219_v31 = vld [vmem:[#allocation3 + $0x48] sm:$0xf0]  ;;  %v1741_v32 = vpack.c.bf16 %v87_v19, %v86_v13 }
  0x25   :  { %v94_v25 = vld [vmem:[%s2013_s0 + $0x2] sm:$0xff]  ;;  %v95_v26 = vld [vmem:[%s2013_s0 + $0xa] sm:$0xff]  ;;  %v1299_v33 = vld [vmem:[#allocation3 + $0xe8] sm:$0xf0]  ;;  %v1743_v36 = vpack.c.bf16 %v91_v24, %v90_v20  ;;  %v1222_v38 = vor.u32 %v1485_v30, %v1219_v31 }
  0x26   :  { %397 = vmatpush.bf16.msra.mxu0 %v1202_v52  ;;  %v1521_v34 = vld [vmem:[#allocation3 + $0x164] sm:$0xf]  ;;  %v1363_v35 = vld [vmem:[#allocation3 + $0x168] sm:$0xf0]  ;;  %v1745_v37 = vpack.c.bf16 %v95_v26, %v94_v25  ;;  %v1302_v39 = vor.u32 %v1505_v29, %v1299_v33  ;;  %v1503_v41 = vld [vmem:[#allocation3 + $0xd4] sm:$0xf] }
  0x27   :  { %416 = vmatpush.bf16.msra.mxu1 %v1266_v56  ;;  %v1366_v40 = vor.u32 %v1521_v34, %v1363_v35  ;;  %v1483_v42 = vld [vmem:[#allocation3 + $0x34] sm:$0xf]  ;;  %v1211_v43 = vld [vmem:[#allocation3 + $0x38] sm:$0xf0]  ;;  %v88_v50 = vld [vmem:[%s2013_s0 + $0x18] sm:$0xff] }
  0x28   :  { %435 = vmatpush.bf16.msra.mxu2 %v1330_v57  ;;  %451 = vmatpush.bf16.msra.mxu3 %v1230_v21  ;;  %v1291_v44 = vld [vmem:[#allocation3 + $0xd8] sm:$0xf0]  ;;  %v1519_v45 = vld [vmem:[#allocation3 + $0x154] sm:$0xf]  ;;  %v1214_v47 = vor.u32 %v1483_v42, %v1211_v43  ;;  %v92_v52 = vld [vmem:[%s2013_s0 + $0x19] sm:$0xff] }
  0x29   :  { %v1355_v46 = vld [vmem:[#allocation3 + $0x158] sm:$0xf0]  ;;  %v1294_v48 = vor.u32 %v1503_v41, %v1291_v44  ;;  %v89_v51 = vld [vmem:[%s2013_s0 + $0x20] sm:$0xff]  ;;  %v1501_v59 = vld [vmem:[#allocation3 + $0xc4] sm:$0xf] }
  0x2a   :  { %398 = vmatpush.bf16.msra.mxu0 %v1194_v2  ;;  %v1358_v49 = vor.u32 %v1519_v45, %v1355_v46  ;;  %v93_v53 = vld [vmem:[%s2013_s0 + $0x21] sm:$0xff]  ;;  %v101_v56 = vpack.c.bf16 %v89_v51, %v88_v50  ;;  %v1283_v60 = vld [vmem:[#allocation3 + $0xc8] sm:$0xf0]  ;;  %v1481_v62 = vld [vmem:[#allocation3 + $0x24] sm:$0xf] }
  0x2b   :  { %417 = vmatpush.bf16.msra.mxu1 %v1258_v7  ;;  %v96_v54 = vld [vmem:[%s2013_s0 + $0x1a] sm:$0xff]  ;;  %v97_v55 = vld [vmem:[%s2013_s0 + $0x22] sm:$0xff]  ;;  %v102_v57 = vpack.c.bf16 %v93_v53, %v92_v52  ;;  %v1286_v61 = vor.u32 %v1501_v59, %v1283_v60  ;;  %v1517_v0 = vld [vmem:[#allocation3 + $0x144] sm:$0xf] }
  0x2c   :  { %436 = vmatpush.bf16.msra.mxu2 %v1322_v8  ;;  %452 = vmatpush.bf16.msra.mxu3 %v1222_v38  ;;  %v1768_v58 = vpack.c.bf16 %v97_v55, %v96_v54  ;;  %v1203_v63 = vld [vmem:[#allocation3 + $0x28] sm:$0xf0]  ;;  %v1499_v4 = vld [vmem:[#allocation3 + $0xb4] sm:$0xf]  ;;  %v1275_v5 = vld [vmem:[#allocation3 + $0xb8] sm:$0xf0] }
  0x2d   :  { %v1206_v1 = vor.u32 %v1481_v62, %v1203_v63  ;;  %v1347_v2 = vld [vmem:[#allocation3 + $0x148] sm:$0xf0]  ;;  %v1278_v6 = vor.u32 %v1499_v4, %v1275_v5  ;;  %v1479_v7 = vld [vmem:[#allocation3 + $0x14] sm:$0xf]  ;;  %v1195_v8 = vld [vmem:[#allocation3 + $0x18] sm:$0xf0] }
  0x2e   :  { %399 = vmatpush.bf16.msra.mxu0 %v1186_v18  ;;  %v1350_v3 = vor.u32 %v1517_v0, %v1347_v2  ;;  %v1515_v9 = vld [vmem:[#allocation3 + $0x134] sm:$0xf]  ;;  %v1198_v10 = vor.u32 %v1479_v7, %v1195_v8  ;;  %v1339_v11 = vld [vmem:[#allocation3 + $0x138] sm:$0xf0]  ;;  %v1497_v13 = vld [vmem:[#allocation3 + $0xa4] sm:$0xf] }
  0x2f   :  { %418 = vmatpush.bf16.msra.mxu1 %v1250_v22  ;;  %v1342_v12 = vor.u32 %v1515_v9, %v1339_v11  ;;  %v1267_v14 = vld [vmem:[#allocation3 + $0xa8] sm:$0xf0]  ;;  %v1477_v16 = vld [vmem:[#allocation3 + $0x4] sm:$0xf]  ;;  %v1495_v22 = vld [vmem:[#allocation3 + $0x94] sm:$0xf] }
  0x30   :  { %437 = vmatpush.bf16.msra.mxu2 %v1314_v23  ;;  %453 = vmatpush.bf16.msra.mxu3 %v1214_v47  ;;  %v1270_v15 = vor.u32 %v1497_v13, %v1267_v14  ;;  %v1187_v17 = vld [vmem:[#allocation3 + $0x8] sm:$0xf0]  ;;  %v1513_v18 = vld [vmem:[#allocation3 + $0x124] sm:$0xf]  ;;  %v1259_v23 = vld [vmem:[#allocation3 + $0x98] sm:$0xf0] }
  0x31   :  { %400 = vmatmul.bf16.vlgmr.msra.gmra.mxu0 %v1741_v32  ;;  %v1190_v19 = vor.u32 %v1477_v16, %v1187_v17  ;;  %v1331_v20 = vld [vmem:[#allocation3 + $0x128] sm:$0xf0]  ;;  %v1262_v24 = vor.u32 %v1495_v22, %v1259_v23  ;;  %v1511_v25 = vld [vmem:[#allocation3 + $0x114] sm:$0xf]  ;;  %v1323_v26 = vld [vmem:[#allocation3 + $0x118] sm:$0xf0] }
  0x32   :  { %468 = vmatpush.bf16.msrb.mxu0 %v1310_v27  ;;  %419 = vmatmul.bf16.vlgmr.msra.gmra.mxu1 %v1743_v36  ;;  %v1334_v21 = vor.u32 %v1513_v18, %v1331_v20  ;;  %v1326_v27 = vor.u32 %v1511_v25, %v1323_v26  ;;  %v1251_v29 = vld [vmem:[#allocation3 + $0x88] sm:$0xf0]  ;;  %v1509_v31 = vld [vmem:[#allocation3 + $0x104] sm:$0xf]  ;;  %v1775_v41 = vld [vmem:[#allocation8 + $0x78] sm:$0xff] }
  0x33   :  { %487 = vmatpush.bf16.msrb.mxu1 %v1374_v28  ;;  %438 = vmatmul.bf16.vlgmr.msra.gmra.mxu2 %v1745_v37  ;;  %v1493_v28 = vld [vmem:[#allocation3 + $0x84] sm:$0xf]  ;;  %v1315_v33 = vld [vmem:[#allocation3 + $0x108] sm:$0xf0]  ;;  %v1783_v47 = vld [vmem:[%s2017_s4] sm:$0xff] }
  0x34   :  { %454 = vmatpush.bf16.msra.mxu3 %v1206_v1  ;;  %v1254_v30 = vor.u32 %v1493_v28, %v1251_v29  ;;  %v1318_v34 = vor.u32 %v1509_v31, %v1315_v33  ;;  %v506_v50 = vperm.slane %v1783_v47, 0  ;;  %v1800_v62 = vld [vmem:[#allocation8 + $0x70] sm:$0xff]  ;;  %v1805_v63 = vld [vmem:[#allocation8 + $0x68] sm:$0xff]  ;;  %v1807_v0 = vld [vmem:[#allocation8 + $0x60] sm:$0xff] }
  0x35   :  { %v1811_v1 = vld [vmem:[#allocation8 + $0x58] sm:$0xff]  ;;  %v1816_v2 = vld [vmem:[#allocation8 + $0x50] sm:$0xff]  ;;  %v1826_v4 = vld [vmem:[#allocation8 + $0x40] sm:$0xff] }
  0x36   :  { %469 = vmatpush.bf16.msrb.mxu0 %v1302_v39  ;;  %v1831_v5 = vld [vmem:[#allocation8 + $0x38] sm:$0xff]  ;;  %v1844_v7 = vld [vmem:[#allocation8 + $0x28] sm:$0xff]  ;;  %v1846_v8 = vld [vmem:[#allocation8 + $0x20] sm:$0xff] }
  0x37   :  { %488 = vmatpush.bf16.msrb.mxu1 %v1366_v40  ;;  %v1851_v9 = vld [vmem:[#allocation8 + $0x18] sm:$0xff]  ;;  %v1864_v11 = vld [vmem:[#allocation8 + $0x8] sm:$0xff]  ;;  %v1871_v33 = vld [vmem:[#allocation8] sm:$0xff] }
  0x38   :  { %455 = vmatpush.bf16.msra.mxu3 %v1198_v10  ;;  %v1856_v10 = vld [vmem:[#allocation8 + $0x10] sm:$0xff] }
  0x3a   :  { %470 = vmatpush.bf16.msrb.mxu0 %v1294_v48 }
  0x3b   :  { %489 = vmatpush.bf16.msrb.mxu1 %v1358_v49 }
  0x3c   :  { %456 = vmatpush.bf16.msra.mxu3 %v1190_v19 }
  0x3e   :  { %471 = vmatpush.bf16.msrb.mxu0 %v1286_v61  ;;  %v1675_v61 = vmov 1.0  }
  0x3f   :  { %490 = vmatpush.bf16.msrb.mxu1 %v1350_v3  ;;  %457 = vmatmul.bf16.vlgmr.msra.gmra.mxu3 %v1741_v32  ;;  %v1824_v3 = vld [vmem:[#allocation8 + $0x48] sm:$0xff] }
  0x40   :  { %540 = vmatpush.msrb.mxu3 %v1775_v41 }
  0x41   :  { %405 = vmatmul.bf16.gmra.mxu0 %v101_v56 }
  0x42   :  { %424 = vmatmul.bf16.gmra.mxu1 %v102_v57  ;;  %472 = vmatpush.bf16.msrb.mxu0 %v1278_v6  ;;  %v1836_v6 = vld [vmem:[#allocation8 + $0x30] sm:$0xff] }
  0x43   :  { %443 = vmatmul.bf16.gmra.mxu2 %v1768_v58  ;;  %491 = vmatpush.bf16.msrb.mxu1 %v1342_v12 }
  0x44   :  { %541 = vmatpush.msrb.mxu3 %v1800_v62 }
  0x46   :  { %473 = vmatpush.bf16.msrb.mxu0 %v1270_v15  ;;  %542 = vmatpush.msrb.mxu3 %v1805_v63 }
  0x47   :  { %492 = vmatpush.bf16.msrb.mxu1 %v1334_v21 }
  0x48   :  { %543 = vmatpush.msrb.mxu3 %v1807_v0 }
  0x4a   :  { %474 = vmatpush.bf16.msrb.mxu0 %v1262_v24  ;;  %544 = vmatpush.msrb.mxu3 %v1811_v1 }
  0x4b   :  { %493 = vmatpush.bf16.msrb.mxu1 %v1326_v27  ;;  %v511_v27 = vperm.slane %v1783_v47, 6 }
  0x4c   :  { %545 = vmatpush.msrb.mxu3 %v1816_v2 }
  0x4e   :  { %475 = vmatpush.bf16.msrb.mxu0 %v1254_v30  ;;  %546 = vmatpush.msrb.mxu3 %v1824_v3 }
  0x4f   :  { %494 = vmatpush.bf16.msrb.mxu1 %v1318_v34  ;;  %462 = vmatmul.bf16.gmra.mxu3 %v101_v56 }
  0x50   :  { %547 = vmatpush.msrb.mxu3 %v1826_v4 }
  0x51   :  { %476 = vmatmul.bf16.vlgmr.msrb.gmra.mxu0 %v1743_v36 }
  0x52   :  { %495 = vmatmul.bf16.vlgmr.msrb.gmra.mxu1 %v1745_v37  ;;  %590 = vmatpush.msra.mxu0 %v1775_v41 }
  0x53   :  { %661 = vmatpush.msra.mxu1 %v1775_v41  ;;  %548 = vmatpush.msrb.mxu3 %v1831_v5 }
  0x54   :  { %591 = vmatpush.msra.mxu0 %v1800_v62 }
  0x55   :  { %662 = vmatpush.msra.mxu1 %v1800_v62  ;;  %549 = vmatpush.msrb.mxu3 %v1836_v6 }
  0x56   :  { %592 = vmatpush.msra.mxu0 %v1805_v63 }
  0x57   :  { %663 = vmatpush.msra.mxu1 %v1805_v63  ;;  %550 = vmatpush.msrb.mxu3 %v1844_v7 }
  0x58   :  { %593 = vmatpush.msra.mxu0 %v1807_v0 }
  0x59   :  { %664 = vmatpush.msra.mxu1 %v1807_v0  ;;  %551 = vmatpush.msrb.mxu3 %v1846_v8 }
  0x5a   :  { %594 = vmatpush.msra.mxu0 %v1811_v1 }
  0x5b   :  { %665 = vmatpush.msra.mxu1 %v1811_v1  ;;  %552 = vmatpush.msrb.mxu3 %v1851_v9 }
  0x5c   :  { %595 = vmatpush.msra.mxu0 %v1816_v2 }
  0x5d   :  { %666 = vmatpush.msra.mxu1 %v1816_v2  ;;  %553 = vmatpush.msrb.mxu3 %v1856_v10 }
  0x5e   :  { %596 = vmatpush.msra.mxu0 %v1824_v3 }
  0x5f   :  { %667 = vmatpush.msra.mxu1 %v1824_v3  ;;  %554 = vmatpush.msrb.mxu3 %v1864_v11 }
  0x60   :  { %597 = vmatpush.msra.mxu0 %v1826_v4 }
  0x61   :  { %481 = vmatmul.bf16.gmra.mxu0 %v102_v57  ;;  %668 = vmatpush.msra.mxu1 %v1826_v4 }
  0x62   :  { %500 = vmatmul.bf16.gmra.mxu1 %v1768_v58  ;;  %598 = vmatpush.msra.mxu0 %v1831_v5 }
  0x63   :  { %669 = vmatpush.msra.mxu1 %v1831_v5  ;;  %555 = vmatpush.msrb.mxu3 %v1871_v33 }
  0x64   :  { %599 = vmatpush.msra.mxu0 %v1836_v6 }
  0x65   :  { %670 = vmatpush.msra.mxu1 %v1836_v6 }
  0x66   :  { %600 = vmatpush.msra.mxu0 %v1844_v7 }
  0x67   :  { %671 = vmatpush.msra.mxu1 %v1844_v7 }
  0x68   :  { %601 = vmatpush.msra.mxu0 %v1846_v8 }
  0x69   :  { %672 = vmatpush.msra.mxu1 %v1846_v8 }
  0x6a   :  { %602 = vmatpush.msra.mxu0 %v1851_v9 }
  0x6b   :  { %673 = vmatpush.msra.mxu1 %v1851_v9 }
  0x6c   :  { %603 = vmatpush.msra.mxu0 %v1856_v10 }
  0x6d   :  { %674 = vmatpush.msra.mxu1 %v1856_v10 }
  0x6e   :  { %604 = vmatpush.msra.mxu0 %v1864_v11 }
  0x6f   :  { %675 = vmatpush.msra.mxu1 %v1864_v11 }
  0x70   :  { %605 = vmatpush.msra.mxu0 %v1871_v33 }
  0x71   :  { %676 = vmatpush.msra.mxu1 %v1871_v33 }
  0xae   :  { %v401_v35 = vpop.f32.mrf.mxu0 }
  0xaf   :  { %v420_v38 = vpop.f32.mrf.mxu1 }
  0xb0   :  { %v421_v51 = vadd.f32 %v420_v38, %v401_v35 }
  0xb6   :  { %v439_v39 = vpop.f32.mrf.mxu2  ;;  %v403_v32 = vpop.f32.mrf.mxu0 }
  0xb7   :  { %v422_v40 = vpop.f32.mrf.mxu1  ;;  %v440_v57 = vadd.f32 %v439_v39, %v421_v51 }
  0xb8   :  { %v423_v52 = vadd.f32 %v422_v40, %v403_v32 }
  0xb9   :  { %v1795_v60 = vadd.f32 %v506_v50, %v440_v57 }
  0xbe   :  { %v441_v36 = vpop.f32.mrf.mxu2  ;;  %v406_v42 = vpop.f32.mrf.mxu0 }
  0xbf   :  { %v425_v37 = vpop.f32.mrf.mxu1  ;;  %v442_v55 = vadd.f32 %v441_v36, %v423_v52 }
  0xc0   :  { %v426_v46 = vadd.f32 %v425_v37, %v406_v42 }
  0xc1   :  { %v1792_v59 = vadd.f32 %v506_v50, %v442_v55 }
  0xc2   :  { %v458_v12 = vpop.f32.mrf.mxu3 }
  0xc6   :  { %v444_v43 = vpop.f32.mrf.mxu2  ;;  %v408_v44 = vpop.f32.mrf.mxu0 }
  0xc7   :  { %v427_v45 = vpop.f32.mrf.mxu1  ;;  %v445_v53 = vadd.f32 %v444_v43, %v426_v46 }
  0xc8   :  { %v428_v48 = vadd.f32 %v427_v45, %v408_v44 }
  0xc9   :  { %v1789_v58 = vadd.f32 %v506_v50, %v445_v53 }
  0xca   :  { %v460_v15 = vpop.f32.mrf.mxu3 }
  0xce   :  { %v446_v49 = vpop.f32.mrf.mxu2  ;;  %v477_v13 = vpop.f32.mrf.mxu0 }
  0xcf   :  { %v447_v54 = vadd.f32 %v446_v49, %v428_v48  ;;  %v496_v14 = vpop.f32.mrf.mxu1  ;;  %v478_v26 = vadd.f32 %v477_v13, %v458_v12 }
  0xd1   :  { %v1786_v56 = vadd.f32 %v506_v50, %v447_v54  ;;  %v497_v34 = vadd.f32 %v496_v14, %v478_v26  ;;  %v1536_v26 = vld [vmem:[#allocation6 + $0x58] sm:$0xff] }
  0xd2   :  { %v463_v18 = vpop.f32.mrf.mxu3 }
  0xd3   :  { %532 = vmatpush.msrb.mxu2 %v1786_v56  ;;  %v512_v32 = vadd.f32 %v511_v27, %v497_v34  ;;  %v1534_v34 = vld [vmem:[#allocation6 + $0x48] sm:$0xff] }
  0xd5   :  { %533 = vmatpush.msrb.mxu2 %v1789_v58 }
  0xd6   :  { %v479_v16 = vpop.f32.mrf.mxu0 }
  0xd7   :  { %534 = vmatpush.msrb.mxu2 %v1792_v59  ;;  %v498_v17 = vpop.f32.mrf.mxu1  ;;  %v480_v22 = vadd.f32 %v479_v16, %v460_v15  ;;  %v1540_v16 = vld [vmem:[#allocation6 + $0x78] sm:$0xff] }
  0xd8   :  { %996 = vmatpush.bf16.msrb.mxu0 %v1540_v16  ;;  %v632_v16 = vperm.slane %v1783_v47, 2 }
  0xd9   :  { %535 = vmatpush.msrb.mxu2 %v1795_v60  ;;  %v499_v30 = vadd.f32 %v498_v17, %v480_v22  ;;  %v1539_v17 = vld [vmem:[#allocation6 + $0x70] sm:$0xff] }
  0xda   :  { %1375 = vmatmul.msk.f32.vlgmr.msrb.gmra.mxu2 %vm516_vm0, %v1675_v61  ;;  %v465_v23 = vpop.f32.mrf.mxu3  ;;  %v1547_v22 = vld [vmem:[#allocation6 + $0xb0] sm:$0xff] }
  0xdb   :  { %v513_v39 = vadd.f32 %v511_v27, %v499_v30  ;;  %v1528_v30 = vld [vmem:[#allocation6 + $0x18] sm:$0xff] }
  0xdc   :  { %997 = vmatpush.bf16.msrb.mxu0 %v1539_v17 }
  0xde   :  { %v482_v19 = vpop.f32.mrf.mxu0 }
  0xdf   :  { %v501_v20 = vpop.f32.mrf.mxu1  ;;  %v483_v21 = vadd.f32 %v482_v19, %v463_v18  ;;  %v1532_v18 = vld [vmem:[#allocation6 + $0x38] sm:$0xff] }
  0xe0   :  { %v1548_v19 = vld [vmem:[#allocation6 + $0xb8] sm:$0xff] }
  0xe1   :  { %v502_v28 = vadd.f32 %v501_v20, %v483_v21  ;;  %v1538_v20 = vld [vmem:[#allocation6 + $0x68] sm:$0xff]  ;;  %1015 = vmatpush.bf16.msrb.mxu1 %v1548_v19  ;;  %v1531_v21 = vld [vmem:[#allocation6 + $0x30] sm:$0xff] }
  0xe2   :  { %998 = vmatpush.bf16.msrb.mxu0 %v1538_v20 }
  0xe3   :  { %v514_v35 = vadd.f32 %v511_v27, %v502_v28  ;;  %v1545_v28 = vld [vmem:[#allocation6 + $0xa0] sm:$0xff] }
  0xe5   :  { %1016 = vmatpush.bf16.msrb.mxu1 %v1547_v22 }
  0xe6   :  { %v484_v24 = vpop.f32.mrf.mxu0 }
  0xe7   :  { %v485_v25 = vadd.f32 %v484_v24, %v465_v23  ;;  %v503_v29 = vpop.f32.mrf.mxu1  ;;  %v1537_v23 = vld [vmem:[#allocation6 + $0x60] sm:$0xff]  ;;  %v1530_v24 = vld [vmem:[#allocation6 + $0x28] sm:$0xff] }
  0xe8   :  { %999 = vmatpush.bf16.msrb.mxu0 %v1537_v23 }
  0xe9   :  { %v504_v31 = vadd.f32 %v503_v29, %v485_v25  ;;  %v1546_v25 = vld [vmem:[#allocation6 + $0xa8] sm:$0xff]  ;;  %v1535_v29 = vld [vmem:[#allocation6 + $0x50] sm:$0xff] }
  0xea   :  { %1017 = vmatpush.bf16.msrb.mxu1 %v1546_v25 }
  0xeb   :  { %v515_v38 = vadd.f32 %v511_v27, %v504_v31  ;;  %v1529_v27 = vld [vmem:[#allocation6 + $0x20] sm:$0xff]  ;;  %v1544_v31 = vld [vmem:[#allocation6 + $0x98] sm:$0xff] }
  0xec   :  { %1000 = vmatpush.bf16.msrb.mxu0 %v1536_v26 }
  0xed   :  { %653 = vmatpush.msra.mxu3 %v515_v38 }
  0xee   :  { %1018 = vmatpush.bf16.msrb.mxu1 %v1545_v28 }
  0xef   :  { %654 = vmatpush.msra.mxu3 %v514_v35 }
  0xf0   :  { %1001 = vmatpush.bf16.msrb.mxu0 %v1535_v29 }
  0xf1   :  { %655 = vmatpush.msra.mxu3 %v513_v39 }
  0xf2   :  { %1019 = vmatpush.bf16.msrb.mxu1 %v1544_v31 }
  0xf3   :  { %656 = vmatpush.msra.mxu3 %v512_v32 }
  0xf4   :  { %1002 = vmatpush.bf16.msrb.mxu0 %v1534_v34 }
 0x15d   :  { %v537_v40 = vpop.f32.mrf.mxu2 }
 0x15e   :  { %556 = vmatmul.f32.vlgmr.msrb.gmra.mxu3 %v537_v40  ;;  %v1533_v40 = vld [vmem:[#allocation6 + $0x40] sm:$0xff] }
 0x15f   :  { %711 = vmatpush.msrb.mxu3 %v1775_v41  ;;  %1003 = vmatpush.bf16.msrb.mxu0 %v1533_v40 }
 0x161   :  { %712 = vmatpush.msrb.mxu3 %v1800_v62 }
 0x163   :  { %713 = vmatpush.msrb.mxu3 %v1805_v63 }
 0x165   :  { %714 = vmatpush.msrb.mxu3 %v1807_v0 }
 0x166   :  { %1377 = vmatmul.msk.f32.vlgmr.msra.gmra.mxu3 %vm516_vm0, %v1675_v61 }
 0x167   :  { %715 = vmatpush.msrb.mxu3 %v1811_v1 }
 0x169   :  { %716 = vmatpush.msrb.mxu3 %v1816_v2 }
 0x16b   :  { %717 = vmatpush.msrb.mxu3 %v1824_v3 }
 0x16d   :  { %718 = vmatpush.msrb.mxu3 %v1826_v4 }
 0x16f   :  { %719 = vmatpush.msrb.mxu3 %v1831_v5 }
 0x171   :  { %720 = vmatpush.msrb.mxu3 %v1836_v6 }
 0x173   :  { %721 = vmatpush.msrb.mxu3 %v1844_v7 }
 0x175   :  { %722 = vmatpush.msrb.mxu3 %v1846_v8 }
 0x177   :  { %723 = vmatpush.msrb.mxu3 %v1851_v9 }
 0x179   :  { %724 = vmatpush.msrb.mxu3 %v1856_v10 }
 0x17b   :  { %725 = vmatpush.msrb.mxu3 %v1864_v11 }
 0x17d   :  { %726 = vmatpush.msrb.mxu3 %v1871_v33 }
 0x1e1   :  { %v557_v36 = vpop.f32.mrf.mxu3 }
 0x1e2   :  { %v560_v42 = vmul.f32 0.001953125, %v557_v36 }
 0x1e4   :  { %v561_v37 = vperm.slane %v560_v42, 0  ;;  %v1526_v42 = vld [vmem:[#allocation6 + $0x8] sm:$0xff] }
 0x1e6   :  { %v1895_v43 = vsub.f32 %v1786_v56, %v561_v37  ;;  %v1898_v44 = vsub.f32 %v1789_v58, %v561_v37  ;;  %v1903_v46 = vsub.f32 %v1792_v59, %v561_v37  ;;  %v1908_v50 = vsub.f32 %v1795_v60, %v561_v37  ;;  %v1542_v37 = vld [vmem:[#allocation6 + $0x88] sm:$0xff] }
 0x1e8   :  { %v569_v45 = vmul.f32 %v1895_v43, %v1895_v43  ;;  %v568_v49 = vmul.f32 %v1898_v44, %v1898_v44  ;;  %v567_v51 = vmul.f32 %v1903_v46, %v1903_v46  ;;  %v566_v52 = vmul.f32 %v1908_v50, %v1908_v50 }
 0x1e9   :  { %v658_v48 = vpop.f32.mrf.mxu3 }
 0x1ea   :  { %582 = vmatpush.msra.mxu2 %v569_v45  ;;  %677 = vmatmul.f32.vlgmr.msra.gmra.mxu1 %v658_v48  ;;  %v1676_v45 = vmov 0.0   ;;  %v1525_v48 = vld [vmem:[#allocation6] sm:$0xff] }
 0x1eb   :  { %758 = vst [vmem:[#allocation2] sm:$0x1] %v1676_v45 }
 0x1ec   :  { %583 = vmatpush.msra.mxu2 %v568_v49  ;;  %759 = vst [vmem:[#allocation2 + $0x18] sm:$0x1] %v1676_v45  ;;  %v1541_v49 = vld [vmem:[#allocation6 + $0x80] sm:$0xff] }
 0x1ed   :  { %760 = vst [vmem:[#allocation2 + $0x11] sm:$0x1] %v1676_v45 }
 0x1ee   :  { %584 = vmatpush.msra.mxu2 %v567_v51  ;;  %761 = vst [vmem:[#allocation2 + $0x29] sm:$0x1] %v1676_v45 }
 0x1f0   :  { %585 = vmatpush.msra.mxu2 %v566_v52 }
 0x1f1   :  { %1376 = vmatmul.msk.f32.vlgmr.msra.gmra.mxu2 %vm516_vm0, %v1675_v61 }
 0x267   :  { %v678_v53 = vpop.f32.mrf.mxu1 }
 0x268   :  { %v681_v54 = vmul.f32 0.001953125, %v678_v53 }
 0x26a   :  { %v682_v55 = vperm.slane %v681_v54, 0 }
 0x26c   :  { %v1916_v56 = vsub.f32 %v515_v38, %v682_v55  ;;  %v1918_v57 = vsub.f32 %v514_v35, %v682_v55  ;;  %v1922_v59 = vsub.f32 %v513_v39, %v682_v55  ;;  %v1926_v12 = vsub.f32 %v512_v32, %v682_v55  ;;  %v1527_v39 = vld [vmem:[#allocation6 + $0x10] sm:$0xff] }
 0x26d   :  { %v1543_v32 = vld [vmem:[#allocation6 + $0x90] sm:$0xff] }
 0x26e   :  { %v690_v58 = vmul.f32 %v1916_v56, %v1916_v56  ;;  %v689_v60 = vmul.f32 %v1918_v57, %v1918_v57  ;;  %v688_v13 = vmul.f32 %v1922_v59, %v1922_v59  ;;  %v687_v15 = vmul.f32 %v1926_v12, %v1926_v12  ;;  %1020 = vmatpush.bf16.msrb.mxu1 %v1543_v32 }
 0x270   :  { %703 = vmatpush.msrb.mxu2 %v690_v58 }
 0x272   :  { %704 = vmatpush.msrb.mxu2 %v689_v60  ;;  %1021 = vmatpush.bf16.msrb.mxu1 %v1542_v37 }
 0x274   :  { %v587_v14 = vpop.f32.mrf.mxu2  ;;  %705 = vmatpush.msrb.mxu2 %v688_v13 }
 0x275   :  { %606 = vmatmul.f32.vlgmr.msra.gmra.mxu0 %v587_v14 }
 0x276   :  { %706 = vmatpush.msrb.mxu2 %v687_v15  ;;  %1022 = vmatpush.bf16.msrb.mxu1 %v1541_v49  ;;  %v627_v15 = vperm.slane %v1783_v47, 1 }
 0x277   :  { %1378 = vmatmul.msk.f32.vlgmr.msrb.gmra.mxu2 %vm516_vm0, %v1675_v61 }
 0x278   :  { %977 = vmatpush.bf16.msra.mxu2 %v1532_v18 }
 0x27c   :  { %978 = vmatpush.bf16.msra.mxu2 %v1531_v21 }
 0x280   :  { %979 = vmatpush.bf16.msra.mxu2 %v1530_v24 }
 0x284   :  { %980 = vmatpush.bf16.msra.mxu2 %v1529_v27 }
 0x288   :  { %981 = vmatpush.bf16.msra.mxu2 %v1528_v30 }
 0x28c   :  { %982 = vmatpush.bf16.msra.mxu2 %v1527_v39 }
 0x290   :  { %983 = vmatpush.bf16.msra.mxu2 %v1526_v42 }
 0x294   :  { %984 = vmatpush.bf16.msra.mxu2 %v1525_v48 }
 0x298   :  { %1054 = vmatpush.msrb.mxu2 %v1775_v41 }
 0x29a   :  { %1055 = vmatpush.msrb.mxu2 %v1800_v62 }
 0x29c   :  { %1056 = vmatpush.msrb.mxu2 %v1805_v63 }
 0x29e   :  { %1057 = vmatpush.msrb.mxu2 %v1807_v0 }
 0x2a0   :  { %1058 = vmatpush.msrb.mxu2 %v1811_v1 }
 0x2a2   :  { %1059 = vmatpush.msrb.mxu2 %v1816_v2 }
 0x2a4   :  { %1060 = vmatpush.msrb.mxu2 %v1824_v3 }
 0x2a6   :  { %1061 = vmatpush.msrb.mxu2 %v1826_v4 }
 0x2a8   :  { %1062 = vmatpush.msrb.mxu2 %v1831_v5 }
 0x2aa   :  { %1063 = vmatpush.msrb.mxu2 %v1836_v6 }
 0x2ac   :  { %1064 = vmatpush.msrb.mxu2 %v1844_v7 }
 0x2ae   :  { %1065 = vmatpush.msrb.mxu2 %v1846_v8 }
 0x2b0   :  { %1066 = vmatpush.msrb.mxu2 %v1851_v9 }
 0x2b2   :  { %1067 = vmatpush.msrb.mxu2 %v1856_v10 }
 0x2b4   :  { %1068 = vmatpush.msrb.mxu2 %v1864_v11 }
 0x2b6   :  { %1069 = vmatpush.msrb.mxu2 %v1871_v33 }
 0x2f2   :  { %v607_v35 = vpop.f32.mrf.mxu0 }
 0x2f3   :  { %v610_v38 = vmul.f32 0.001953125, %v607_v35 }
 0x2f5   :  { %v611_v36 = vadd.f32 1e-05, %v610_v38 }
 0x2f7   :  { %1560 = vrsqrt.f32 %v611_v36  ;;  %vm618_vm2 = vweird.f32 %v611_v36 }
 0x2fa   :  { %v708_v51 = vpop.f32.mrf.mxu2 }
 0x2fb   :  { %727 = vmatmul.f32.vlgmr.msrb.gmra.mxu3 %v708_v51 }
 0x2fd   :  { %v1561_v52 = vpop.eup %1560 }
 0x2fe   :  { %v613_v53 = vmul.f32 %v1561_v52, %v611_v36  ;;  %vm619_vm1 = vweird.f32 %v1561_v52 }
 0x2ff   :  { %vm620_vm3 = vmor %vm618_vm2, %vm619_vm1 }
 0x300   :  { %v614_v54 = vmul.f32 %v1561_v52, %v613_v53 }
 0x302   :  { %v615_v55 = vmul.f32 0.5, %v614_v54 }
 0x304   :  { %v616_v58 = vsub.f32 1.5, %v615_v55 }
 0x306   :  { %v617_v60 = vmul.f32 %v1561_v52, %v616_v58 }
 0x308   :  { %v621_v13 = vsel %vm620_vm3, %v1561_v52, %v617_v60 }
 0x309   :  { %v622_v14 = vperm.slane %v621_v13, 0 }
 0x30b   :  { %v623_v17 = vmul.f32 %v622_v14, %v1908_v50  ;;  %v624_v18 = vmul.f32 %v622_v14, %v1903_v46  ;;  %v625_v19 = vmul.f32 %v622_v14, %v1898_v44  ;;  %v626_v20 = vmul.f32 %v622_v14, %v1895_v43 }
 0x30c   :  { %v832_v14 = vperm.slane %v1783_v47, 3 }
 0x30d   :  { %v628_v21 = vmul.f32 %v627_v15, %v623_v17  ;;  %v629_v22 = vmul.f32 %v627_v15, %v624_v18  ;;  %v630_v23 = vmul.f32 %v627_v15, %v625_v19  ;;  %v631_v24 = vmul.f32 %v627_v15, %v626_v20 }
 0x30f   :  { %v633_v25 = vadd.f32 %v632_v16, %v628_v21  ;;  %v634_v26 = vadd.f32 %v632_v16, %v629_v22  ;;  %v635_v27 = vadd.f32 %v632_v16, %v630_v23  ;;  %v636_v28 = vadd.f32 %v632_v16, %v631_v24 }
 0x311   :  { %v637_v50 = vmax.f32 %v633_v25, 0.0  ;;  %v638_v46 = vmax.f32 %v634_v26, 0.0  ;;  %v639_v29 = vmax.f32 %v635_v27, 0.0  ;;  %v640_v44 = vmax.f32 %v636_v28, 0.0 }
 0x313   :  { %762 = vst [vmem:[#allocation2 + $0x1] sm:$0xff] %v637_v50  ;;  %v779_v43 = vpack.c.bf16 %v638_v46, %v637_v50  ;;  %v782_v32 = vpack.c.bf16 %v640_v44, %v639_v29 }
 0x314   :  { %763 = vst [vmem:[#allocation2 + $0x9] sm:$0xff] %v638_v46 }
 0x315   :  { %764 = vst [vmem:[#allocation2 + $0x19] sm:$0xff] %v639_v29  ;;  %1004 = vmatmul.bf16.vlgmr.msrb.gmra.mxu0 %v779_v43 }
 0x316   :  { %765 = vst [vmem:[#allocation2 + $0x21] sm:$0xff] %v640_v44 }
 0x31a   :  { %v766_v30 = vld [vmem:[#allocation2] sm:$0xff] }
 0x31b   :  { %v767_v31 = vld [vmem:[#allocation2 + $0x8] sm:$0xff] }
 0x31c   :  { %v774_v34 = vld [vmem:[#allocation2 + $0x2] sm:$0xff]  ;;  %v775_v35 = vld [vmem:[#allocation2 + $0xa] sm:$0xff]  ;;  %v778_v38 = vpack.c.bf16 %v767_v31, %v766_v30  ;;  %v768_v40 = vld [vmem:[#allocation2 + $0x18] sm:$0xff] }
 0x31d   :  { %v780_v39 = vpack.c.bf16 %v775_v35, %v774_v34  ;;  %v769_v36 = vld [vmem:[#allocation2 + $0x20] sm:$0xff] }
 0x31e   :  { %985 = vmatmul.bf16.vlgmr.msra.gmra.mxu2 %v778_v38  ;;  %v776_v42 = vld [vmem:[#allocation2 + $0x1a] sm:$0xff]  ;;  %v777_v37 = vld [vmem:[#allocation2 + $0x22] sm:$0xff]  ;;  %v781_v45 = vpack.c.bf16 %v769_v36, %v768_v40 }
 0x31f   :  { %1023 = vmatmul.bf16.vlgmr.msrb.gmra.mxu1 %v780_v39  ;;  %v783_v48 = vpack.c.bf16 %v777_v37, %v776_v42 }
 0x325   :  { %1009 = vmatmul.bf16.gmra.mxu0 %v782_v32 }
 0x32e   :  { %990 = vmatmul.bf16.gmra.mxu2 %v781_v45 }
 0x32f   :  { %1028 = vmatmul.bf16.gmra.mxu1 %v783_v48 }
 0x37e   :  { %v728_v46 = vpop.f32.mrf.mxu3 }
 0x392   :  { %v1005_v49 = vpop.f32.mrf.mxu0 }
 0x39a   :  { %v1007_v53 = vpop.f32.mrf.mxu0 }
 0x39c   :  { %v1024_v51 = vpop.f32.mrf.mxu1 }
 0x3a1   :  { %v986_v52 = vpop.f32.mrf.mxu2 }
 0x3a2   :  { %v1010_v58 = vpop.f32.mrf.mxu0  ;;  %v987_v20 = vadd.f32 %v986_v52, %v832_v14 }
 0x3a4   :  { %v1026_v54 = vpop.f32.mrf.mxu1  ;;  %v1006_v26 = vadd.f32 %v1005_v49, %v987_v20  ;;  %v748_v49 = vperm.slane %v1783_v47, 7 }
 0x3a6   :  { %v1025_v50 = vadd.f32 %v1024_v51, %v1006_v26 }
 0x3a9   :  { %v988_v55 = vpop.f32.mrf.mxu2 }
 0x3aa   :  { %v989_v17 = vadd.f32 %v988_v55, %v832_v14  ;;  %v1012_v19 = vpop.f32.mrf.mxu0 }
 0x3ac   :  { %v1029_v13 = vpop.f32.mrf.mxu1  ;;  %v1008_v24 = vadd.f32 %v1007_v53, %v989_v17 }
 0x3ae   :  { %v1027_v28 = vadd.f32 %v1026_v54, %v1008_v24 }
 0x3b1   :  { %v991_v60 = vpop.f32.mrf.mxu2 }
 0x3b2   :  { %v992_v15 = vadd.f32 %v991_v60, %v832_v14  ;;  %v1141_v60 = vperm.slane %v1783_v47, 4 }
 0x3b4   :  { %v1011_v21 = vadd.f32 %v1010_v58, %v992_v15  ;;  %v1031_v23 = vpop.f32.mrf.mxu1 }
 0x3b6   :  { %v1030_v27 = vadd.f32 %v1029_v13, %v1011_v21 }
 0x3b9   :  { %v993_v16 = vpop.f32.mrf.mxu2 }
 0x3ba   :  { %v994_v18 = vadd.f32 %v993_v16, %v832_v14 }
 0x3bc   :  { %v1013_v22 = vadd.f32 %v1012_v19, %v994_v18 }
 0x3be   :  { %v1032_v25 = vadd.f32 %v1031_v23, %v1013_v22 }
 0x3c0   :  { %1046 = vmatpush.msra.mxu3 %v1032_v25 }
 0x3c2   :  { %1047 = vmatpush.msra.mxu3 %v1030_v27 }
 0x3c4   :  { %1048 = vmatpush.msra.mxu3 %v1027_v28 }
 0x3c6   :  { %1049 = vmatpush.msra.mxu3 %v1025_v50 }
 0x3c7   :  { %1475 = vmatmul.msk.f32.vlgmr.msra.gmra.mxu3 %vm516_vm0, %v1675_v61 }
 0x44a   :  { %v1051_v29 = vpop.f32.mrf.mxu3 }
 0x44b   :  { %1070 = vmatmul.f32.vlgmr.msrb.gmra.mxu2 %v1051_v29 }
 0x4ce   :  { %v1071_v44 = vpop.f32.mrf.mxu2 }
 0x4cf   :  { %v1074_v43 = vmul.f32 0.001953125, %v1071_v44 }
 0x4d1   :  { %v1075_v30 = vperm.slane %v1074_v43, 0 }
 0x4d3   :  { %v1959_v31 = vsub.f32 %v1032_v25, %v1075_v30  ;;  %v1961_v34 = vsub.f32 %v1030_v27, %v1075_v30  ;;  %v1965_v38 = vsub.f32 %v1027_v28, %v1075_v30  ;;  %v1969_v32 = vsub.f32 %v1025_v50, %v1075_v30 }
 0x4d5   :  { %v1083_v35 = vmul.f32 %v1959_v31, %v1959_v31  ;;  %v1082_v39 = vmul.f32 %v1961_v34, %v1961_v34  ;;  %v1081_v40 = vmul.f32 %v1965_v38, %v1965_v38  ;;  %v1080_v36 = vmul.f32 %v1969_v32, %v1969_v32 }
 0x4d7   :  { %1096 = vmatpush.msrb.mxu3 %v1083_v35 }
 0x4d9   :  { %1097 = vmatpush.msrb.mxu3 %v1082_v39 }
 0x4db   :  { %1098 = vmatpush.msrb.mxu3 %v1081_v40 }
 0x4dd   :  { %1099 = vmatpush.msrb.mxu3 %v1080_v36 }
 0x4de   :  { %1476 = vmatmul.msk.f32.vlgmr.msrb.gmra.mxu3 %vm516_vm0, %v1675_v61  ;;  %v731_v61 = vmul.f32 0.001953125, %v728_v46 }
 0x4df   :  { %1104 = vmatpush.msra.mxu3 %v1775_v41 }
 0x4e1   :  { %1105 = vmatpush.msra.mxu3 %v1800_v62  ;;  %v732_v62 = vadd.f32 1e-05, %v731_v61 }
 0x4e3   :  { %1106 = vmatpush.msra.mxu3 %v1805_v63  ;;  %1562 = vrsqrt.f32 %v732_v62  ;;  %vm739_vm4 = vweird.f32 %v732_v62 }
 0x4e5   :  { %1107 = vmatpush.msra.mxu3 %v1807_v0 }
 0x4e7   :  { %1108 = vmatpush.msra.mxu3 %v1811_v1 }
 0x4e9   :  { %1109 = vmatpush.msra.mxu3 %v1816_v2  ;;  %v1563_v63 = vpop.eup %1562 }
 0x4ea   :  { %v734_v0 = vmul.f32 %v1563_v63, %v732_v62  ;;  %vm740_vm5 = vweird.f32 %v1563_v63 }
 0x4eb   :  { %1110 = vmatpush.msra.mxu3 %v1824_v3  ;;  %vm741_vm6 = vmor %vm739_vm4, %vm740_vm5 }
 0x4ec   :  { %v735_v1 = vmul.f32 %v1563_v63, %v734_v0 }
 0x4ed   :  { %1111 = vmatpush.msra.mxu3 %v1826_v4 }
 0x4ee   :  { %v736_v2 = vmul.f32 0.5, %v735_v1 }
 0x4ef   :  { %1112 = vmatpush.msra.mxu3 %v1831_v5 }
 0x4f1   :  { %1113 = vmatpush.msra.mxu3 %v1836_v6  ;;  %v737_v6 = vsub.f32 1.5, %v736_v2 }
 0x4f3   :  { %1114 = vmatpush.msra.mxu3 %v1844_v7  ;;  %v738_v7 = vmul.f32 %v1563_v63, %v737_v6 }
 0x4f5   :  { %1115 = vmatpush.msra.mxu3 %v1846_v8 }
 0x4f7   :  { %1116 = vmatpush.msra.mxu3 %v1851_v9  ;;  %v742_v9 = vsel %vm741_vm6, %v1563_v63, %v738_v7 }
 0x4f9   :  { %1117 = vmatpush.msra.mxu3 %v1856_v10 }
 0x4fb   :  { %1118 = vmatpush.msra.mxu3 %v1864_v11 }
 0x4fd   :  { %1119 = vmatpush.msra.mxu3 %v1871_v33  ;;  %v743_v33 = vperm.slane %v742_v9, 0 }
 0x4ff   :  { %v744_v45 = vmul.f32 %v743_v33, %v1926_v12  ;;  %v745_v48 = vmul.f32 %v743_v33, %v1922_v59  ;;  %v746_v51 = vmul.f32 %v743_v33, %v1918_v57  ;;  %v747_v52 = vmul.f32 %v743_v33, %v1916_v56  ;;  %v1559_v59 = vld [vmem:[%s2017_s4 + $0x8] ss:$0 sm:$0xff]  ;;  %s1677_s4 = smov [#allocation9]  }
 0x500   :  { %v1146_v12 = vperm.slane %v1783_v47, 5  ;;  %s1167_s10 = sshll.u32 %s1677_s4, 4  ;;  %s1168_s10 = int_to_ptr.vmem [resolvable:$true] %s1167_s10 }
 0x501   :  { %v749_v58 = vmul.f32 %v748_v49, %v744_v45  ;;  %v750_v13 = vmul.f32 %v748_v49, %v745_v48  ;;  %v751_v14 = vmul.f32 %v748_v49, %v746_v51  ;;  %v752_v15 = vmul.f32 %v748_v49, %v747_v52 }
 0x503   :  { %v754_v22 = vadd.f32 %v1559_v59, %v749_v58  ;;  %v755_v23 = vadd.f32 %v1559_v59, %v750_v13  ;;  %v756_v24 = vadd.f32 %v1559_v59, %v751_v14  ;;  %v757_v25 = vadd.f32 %v1559_v59, %v752_v15 }
 0x561   :  { %v1101_v41 = vpop.f32.mrf.mxu3 }
 0x562   :  { %1120 = vmatmul.f32.vlgmr.msra.gmra.mxu3 %v1101_v41 }
 0x5e5   :  { %v1121_v3 = vpop.f32.mrf.mxu3 }
 0x5e6   :  { %v1124_v4 = vmul.f32 0.001953125, %v1121_v3 }
 0x5e8   :  { %v1125_v5 = vadd.f32 1e-05, %v1124_v4 }
 0x5ea   :  { %1564 = vrsqrt.f32 %v1125_v5  ;;  %vm1132_vm8 = vweird.f32 %v1125_v5 }
 0x5f0   :  { %v1565_v8 = vpop.eup %1564 }
 0x5f1   :  { %v1127_v10 = vmul.f32 %v1565_v8, %v1125_v5  ;;  %vm1133_vm7 = vweird.f32 %v1565_v8 }
 0x5f2   :  { %vm1134_vm9 = vmor %vm1132_vm8, %vm1133_vm7 }
 0x5f3   :  { %v1128_v11 = vmul.f32 %v1565_v8, %v1127_v10 }
 0x5f5   :  { %v1129_v42 = vmul.f32 0.5, %v1128_v11 }
 0x5f7   :  { %v1130_v37 = vsub.f32 1.5, %v1129_v42 }
 0x5f9   :  { %v1131_v53 = vmul.f32 %v1565_v8, %v1130_v37 }
 0x5fb   :  { %v1135_v54 = vsel %vm1134_vm9, %v1565_v8, %v1131_v53 }
 0x5fc   :  { %v1136_v55 = vperm.slane %v1135_v54, 0 }
 0x5fe   :  { %v1137_v57 = vmul.f32 %v1136_v55, %v1969_v32  ;;  %v1138_v56 = vmul.f32 %v1136_v55, %v1965_v38  ;;  %v1139_v16 = vmul.f32 %v1136_v55, %v1961_v34  ;;  %v1140_v17 = vmul.f32 %v1136_v55, %v1959_v31 }
 0x600   :  { %v1142_v18 = vmul.f32 %v1141_v60, %v1137_v57  ;;  %v1143_v19 = vmul.f32 %v1141_v60, %v1138_v56  ;;  %v1144_v20 = vmul.f32 %v1141_v60, %v1139_v16  ;;  %v1145_v21 = vmul.f32 %v1141_v60, %v1140_v17 }
 0x602   :  { %v1147_v26 = vadd.f32 %v1146_v12, %v1142_v18  ;;  %v1148_v27 = vadd.f32 %v1146_v12, %v1143_v19  ;;  %v1149_v28 = vadd.f32 %v1146_v12, %v1144_v20  ;;  %v1150_v47 = vadd.f32 %v1146_v12, %v1145_v21 }
 0x604   :  { %v1151_v50 = vadd.f32 %v1147_v26, %v754_v22  ;;  %v1152_v46 = vadd.f32 %v1148_v27, %v755_v23  ;;  %v1153_v29 = vadd.f32 %v1149_v28, %v756_v24  ;;  %v1154_v44 = vadd.f32 %v1150_v47, %v757_v25 }
 0x606   :  { %v1155_v43 = vmax.f32 %v1151_v50, 0.0  ;;  %v1156_v30 = vmax.f32 %v1152_v46, 0.0  ;;  %v1157_v34 = vmax.f32 %v1153_v29, 0.0  ;;  %v1158_v31 = vmax.f32 %v1154_v44, 0.0 }
 0x608   :  { %1159 = vst [vmem:[#allocation9] sm:$0xff] %v1155_v43 }
 0x609   :  { %1160 = vst [vmem:[#allocation9 + $0x8] sm:$0xff] %v1156_v30 }
 0x60a   :  { %1161 = vst [vmem:[#allocation9 + $0x10] sm:$0xff] %v1157_v34 }
 0x60b   :  { %1162 = vst [vmem:[#allocation9 + $0x18] sm:$0xff] %v1158_v31 }
 0x60c   :  { %1175 = dma.vmem_to_hbm [thread:$0]  %s1168_s10, 512, %s1170_s13, [#allocation5], %s1672_s30, %s1672_s30, %s1673_s6  }
 0x60d   :  { %1666 = dma.done.wait [#allocation5], 512  }
 0x60e   :  { %1667 = vsyncadd [#allocation5], 4294966784 }
 0x60f   :  { %1180 = vsyncpa [#allocation4], 1 }
 0x610   :  { %1181 = vsyncpa [#allocation7], 1 }
 0x611   :  { %1182 = vsyncpa [#allocation5], 1 }

</bundles_post_ra>
